<compile_context>
chip_gen: v7x
topology: tpu7x:2x2x1
jax: 0.10.0
libtpu: 0.0.40
codegen_flags: <defaults>
</compile_context>

<pallas_src>
import jax
import jax.numpy as jnp
from jax import lax
from jax.experimental import pallas as pl
from jax.experimental.pallas import tpu as pltpu


def _pick_row_tile(h_out: int, w_out: int, target_rows: int = 4096) -> int:
    """Row-tile height TH (must divide h_out).

    Requires TH * w_out to be a multiple of 128 (lane-dense output stores)
    unless the whole image fits in one tile.  Never falls back to TH = 1
    (that would mean masked vst + a huge grid); instead it falls back to the
    whole image as a single tile.
    """
    if h_out * w_out <= target_rows:
        return h_out
    for th in range(h_out, 0, -1):
        if h_out % th == 0 and th * w_out <= target_rows and (th * w_out) % 128 == 0:
            return th
    return h_out  # no lane-dense divisor tile: single whole-image tile


def conv_relu_pallas(x_nchw, w_oihw, bias, *, stride=1, padding=1,
                     compute_dtype=jnp.bfloat16, out_dtype=jnp.float32,
                     target_rows=4096):
    """Conv2d(weight=w_oihw, stride=1, padding=padding) + ReLU, NCHW in/out."""
    assert stride == 1, "only stride=1 is implemented"
    N, Cin, H, W = x_nchw.shape
    Cout, Cin_w, KH, KW = w_oihw.shape
    assert Cin_w == Cin
    H_out = H + 2 * padding - KH + 1
    W_out = W + 2 * padding - KW + 1
    assert H_out > 0 and W_out > 0

    TH = _pick_row_tile(H_out, W_out, target_rows)   # divides H_out
    n_t = H_out // TH
    halo = KH - 1
    THW = TH * W_out
    Hp, Wp = H + 2 * padding, W + 2 * padding

    # For large Cin, skip the per-dy concat entirely (9 per-tap matmuls,
    # K = Cin already fills the systolic depth, zero im2col copies).
    per_tap = Cin >= 64

    # ---- wrapper-side glue (plain JAX, one pass; no halo duplication) ------
    # Cast to bf16 BEFORE transpose/pad so the layout glue moves half the bytes.
    x_c = x_nchw.astype(compute_dtype)
    x_nhwc = jnp.transpose(x_c, (0, 2, 3, 1))                       # (N,H,W,Cin)
    x_pad = jnp.pad(x_nhwc,
                    ((0, 0), (padding, padding), (padding, padding), (0, 0)))

    if per_tap:
        # (KH, KW, Cout, Cin): w_k[dy, dx, o, c] = w[o, c, dy, dx]
        w_k = jnp.transpose(w_oihw, (2, 3, 0, 1)).astype(compute_dtype)
        w_spec = pl.BlockSpec((KH, KW, Cout, Cin), lambda n, i: (0, 0, 0, 0))
    else:
        # (KH, Cout, KW*Cin): K index order (dx, cin) matches the in-kernel concat.
        w_k = jnp.transpose(w_oihw, (2, 0, 3, 1)).reshape(KH, Cout, KW * Cin)
        w_k = w_k.astype(compute_dtype)
        w_spec = pl.BlockSpec((KH, Cout, KW * Cin), lambda n, i: (0, 0, 0))

    b_col = bias.reshape(Cout, 1).astype(jnp.float32)

    # ---- kernel -------------------------------------------------------------
    def kernel(x_ref, w_ref, b_ref, o_ref):
        # x_ref: (1, Hp, Wp, Cin) bf16  -- whole padded image, resident across
        #                                  the row-tile grid axis (index_map
        #                                  depends only on n).
        # w_ref: folded conv weight, bf16 (grid-invariant).
        # b_ref: (Cout, 1) f32
        # o_ref: (1, Cout, TH*W_out)    -- lane-dense output slab.
        if n_t == 1:
            x_win = x_ref[0]                                   # (Hp, Wp, Cin) bf16
        else:
            row0 = pl.multiple_of(pl.program_id(1) * TH, TH)
            x_win = x_ref[0, pl.ds(row0, TH + halo), :, :]     # (TH+halo, Wp, Cin)

        acc = None                                             # f32 (Cout, THW)
        if per_tap:
            # 9 accumulating matmuls, K = Cin; no im2col buffer at all.
            for dy in range(KH):
                for dx in range(KW):
                    tap = x_win[dy:dy + TH, dx:dx + W_out, :].reshape(THW, Cin)
                    part = lax.dot_general(
                        w_ref[dy, dx], tap,
                        dimension_numbers=(((1,), (1,)), ((), ())),
                        preferred_element_type=jnp.float32)
                    acc = part if acc is None else acc + part
        else:
            # Small Cin: fold K per kernel row (3 matmuls, K = KW*Cin); at most
            # KW tap slices are live at once, all kept in bf16.
            for dy in range(KH):
                x_dy = jnp.concatenate(
                    [x_win[dy:dy + TH, dx:dx + W_out, :].reshape(THW, Cin)
                     for dx in range(KW)], axis=-1)            # (THW, KW*Cin) bf16
                part = lax.dot_general(
                    w_ref[dy], x_dy,
                    dimension_numbers=(((1,), (1,)), ((), ())),
                    preferred_element_type=jnp.float32)
                acc = part if acc is None else acc + part

        acc = acc + b_ref[...]                                 # bias (Cout, 1) bcast
        o_ref[0] = jnp.maximum(acc, 0.0).astype(o_ref.dtype)

    # NOTE: at Cout << 128 the MXU M-dim is underfilled; production code would
    # route tiny-Cout layers to the XLA conv instead of this kernel.
    out = pl.pallas_call(
        kernel,
        out_shape=jax.ShapeDtypeStruct((N, Cout, H_out * W_out), out_dtype),
        grid=(N, n_t),
        in_specs=[
            pl.BlockSpec((1, Hp, Wp, Cin), lambda n, i: (n, 0, 0, 0)),
            w_spec,
            pl.BlockSpec((Cout, 1), lambda n, i: (0, 0)),
        ],
        out_specs=pl.BlockSpec((1, Cout, THW), lambda n, i: (n, 0, i)),
        compiler_params=pltpu.CompilerParams(
            dimension_semantics=("parallel", "parallel"),
            vmem_limit_bytes=48 * 1024 * 1024),
    )(x_pad, w_k, b_col)

    # (N, Cout, H_out*W_out) -> (N, Cout, H_out, W_out): pure reshape, no transpose.
    return out.reshape(N, Cout, H_out, W_out)


if __name__ == "__main__":
    key = jax.random.PRNGKey(0)
    kx, kw, kb = jax.random.split(key, 3)

    N, Cin, H, W = 2, 4, 16, 16
    Cout, K = 8, 3

    x = jax.random.normal(kx, (N, Cin, H, W), jnp.float32)
    # deterministic "Conv2d" parameters (PyTorch weight layout: OIHW)
    fan_in = Cin * K * K
    bound = 1.0 / jnp.sqrt(fan_in)
    w = jax.random.uniform(kw, (Cout, Cin, K, K), jnp.float32, -bound, bound)
    b = jax.random.uniform(kb, (Cout,), jnp.float32, -bound, bound)

    conv = jax.jit(conv_relu_pallas)
    out = jax.block_until_ready(conv(x, w, b))

    # reference: lax conv (NCHW/OIHW) + bias + relu, full f32
    ref = lax.conv_general_dilated(
        x, w, window_strides=(1, 1), padding=((1, 1), (1, 1)),
        dimension_numbers=("NCHW", "OIHW", "NCHW"))
    ref = jnp.maximum(ref + b[None, :, None, None], 0.0)

    assert out.shape == (N, Cout, H, W), out.shape
    max_err = float(jnp.max(jnp.abs(out.astype(jnp.float32) - ref)))
    # bf16 activations/weights with f32 accumulation -> loosened tolerance
    assert max_err < 5e-2, f"mismatch vs reference conv: {max_err}"

    print("KERNEL_OK")
</pallas_src>

<mosaic_0001>
module attributes {stable_mosaic.version = 11 : i64} {
  func.func @kernel(%arg0: i32, %arg1: i32, %arg2: memref<1x18x18x4xbf16, #tpu.memory_space<vmem>>, %arg3: memref<3x8x12xbf16, #tpu.memory_space<vmem>>, %arg4: memref<8x1xf32, #tpu.memory_space<vmem>>, %arg5: memref<1x8x256xf32, #tpu.memory_space<vmem>>) attributes {dimension_semantics = [#tpu.dimension_semantics<parallel>, #tpu.dimension_semantics<parallel>], iteration_bounds = array<i64: 2, 1>, scalar_prefetch = 0 : i64, scratch_operands = 0 : i64, tpu.core_type = #tpu.core_type<tc>, window_params = [{transform_indices = @transform_0, window_bounds = array<i64: 1, 18, 18, 4>}, {pipeline_mode = #tpu.pipeline_mode<synchronous>, transform_indices = @transform_1, window_bounds = array<i64: 3, 8, 12>}, {pipeline_mode = #tpu.pipeline_mode<synchronous>, transform_indices = @transform_2, window_bounds = array<i64: 8, 1>}, {transform_indices = @transform_3, window_bounds = array<i64: 1, 8, 256>}]} {
    %c0 = arith.constant 0 : index
    %c0_0 = arith.constant 0 : index
    %c0_1 = arith.constant 0 : index
    %c0_2 = arith.constant 0 : index
    %0 = vector.load %arg2[%c0, %c0_0, %c0_1, %c0_2] : memref<1x18x18x4xbf16, #tpu.memory_space<vmem>>, vector<1x18x18x4xbf16>
    %1 = vector.shape_cast %0 : vector<1x18x18x4xbf16> to vector<18x18x4xbf16>
    %2 = vector.extract_strided_slice %1 {offsets = [0, 0, 0], sizes = [16, 16, 4], strides = [1, 1, 1]} : vector<18x18x4xbf16> to vector<16x16x4xbf16>
    %3 = vector.shape_cast %2 : vector<16x16x4xbf16> to vector<256x4xbf16>
    %4 = vector.extract_strided_slice %1 {offsets = [0, 1, 0], sizes = [16, 16, 4], strides = [1, 1, 1]} : vector<18x18x4xbf16> to vector<16x16x4xbf16>
    %5 = vector.shape_cast %4 : vector<16x16x4xbf16> to vector<256x4xbf16>
    %6 = vector.extract_strided_slice %1 {offsets = [0, 2, 0], sizes = [16, 16, 4], strides = [1, 1, 1]} : vector<18x18x4xbf16> to vector<16x16x4xbf16>
    %7 = vector.shape_cast %6 : vector<16x16x4xbf16> to vector<256x4xbf16>
    %8 = tpu.concatenate %3, %5, %7 in 1 : vector<256x4xbf16>, vector<256x4xbf16>, vector<256x4xbf16> -> vector<256x12xbf16>
    %c0_3 = arith.constant 0 : index
    %c0_4 = arith.constant 0 : index
    %c0_5 = arith.constant 0 : index
    %9 = vector.load %arg3[%c0_3, %c0_4, %c0_5] : memref<3x8x12xbf16, #tpu.memory_space<vmem>>, vector<1x8x12xbf16>
    %10 = vector.shape_cast %9 : vector<1x8x12xbf16> to vector<8x12xbf16>
    %cst = arith.constant dense<0.000000e+00> : vector<8x256xf32>
    %11 = tpu.matmul %10, %8, %cst {dimension_numbers = #tpu.dot_dimension_numbers<[1], [1], [0], [0], [0, 0, 1, 0], [], []>} : vector<8x12xbf16>, vector<256x12xbf16>, vector<8x256xf32> -> vector<8x256xf32>
    %12 = vector.extract_strided_slice %1 {offsets = [1, 0, 0], sizes = [16, 16, 4], strides = [1, 1, 1]} : vector<18x18x4xbf16> to vector<16x16x4xbf16>
    %13 = vector.shape_cast %12 : vector<16x16x4xbf16> to vector<256x4xbf16>
    %14 = vector.extract_strided_slice %1 {offsets = [1, 1, 0], sizes = [16, 16, 4], strides = [1, 1, 1]} : vector<18x18x4xbf16> to vector<16x16x4xbf16>
    %15 = vector.shape_cast %14 : vector<16x16x4xbf16> to vector<256x4xbf16>
    %16 = vector.extract_strided_slice %1 {offsets = [1, 2, 0], sizes = [16, 16, 4], strides = [1, 1, 1]} : vector<18x18x4xbf16> to vector<16x16x4xbf16>
    %17 = vector.shape_cast %16 : vector<16x16x4xbf16> to vector<256x4xbf16>
    %18 = tpu.concatenate %13, %15, %17 in 1 : vector<256x4xbf16>, vector<256x4xbf16>, vector<256x4xbf16> -> vector<256x12xbf16>
    %c1 = arith.constant 1 : index
    %c0_6 = arith.constant 0 : index
    %c0_7 = arith.constant 0 : index
    %19 = vector.load %arg3[%c1, %c0_6, %c0_7] : memref<3x8x12xbf16, #tpu.memory_space<vmem>>, vector<1x8x12xbf16>
    %20 = vector.shape_cast %19 : vector<1x8x12xbf16> to vector<8x12xbf16>
    %cst_8 = arith.constant dense<0.000000e+00> : vector<8x256xf32>
    %21 = tpu.matmul %20, %18, %cst_8 {dimension_numbers = #tpu.dot_dimension_numbers<[1], [1], [0], [0], [0, 0, 1, 0], [], []>} : vector<8x12xbf16>, vector<256x12xbf16>, vector<8x256xf32> -> vector<8x256xf32>
    %22 = arith.addf %11, %21 : vector<8x256xf32>
    %23 = vector.extract_strided_slice %1 {offsets = [2, 0, 0], sizes = [16, 16, 4], strides = [1, 1, 1]} : vector<18x18x4xbf16> to vector<16x16x4xbf16>
    %24 = vector.shape_cast %23 : vector<16x16x4xbf16> to vector<256x4xbf16>
    %25 = vector.extract_strided_slice %1 {offsets = [2, 1, 0], sizes = [16, 16, 4], strides = [1, 1, 1]} : vector<18x18x4xbf16> to vector<16x16x4xbf16>
    %26 = vector.shape_cast %25 : vector<16x16x4xbf16> to vector<256x4xbf16>
    %27 = vector.extract_strided_slice %1 {offsets = [2, 2, 0], sizes = [16, 16, 4], strides = [1, 1, 1]} : vector<18x18x4xbf16> to vector<16x16x4xbf16>
    %28 = vector.shape_cast %27 : vector<16x16x4xbf16> to vector<256x4xbf16>
    %29 = tpu.concatenate %24, %26, %28 in 1 : vector<256x4xbf16>, vector<256x4xbf16>, vector<256x4xbf16> -> vector<256x12xbf16>
    %c2 = arith.constant 2 : index
    %c0_9 = arith.constant 0 : index
    %c0_10 = arith.constant 0 : index
    %30 = vector.load %arg3[%c2, %c0_9, %c0_10] : memref<3x8x12xbf16, #tpu.memory_space<vmem>>, vector<1x8x12xbf16>
    %31 = vector.shape_cast %30 : vector<1x8x12xbf16> to vector<8x12xbf16>
    %cst_11 = arith.constant dense<0.000000e+00> : vector<8x256xf32>
    %32 = tpu.matmul %31, %29, %cst_11 {dimension_numbers = #tpu.dot_dimension_numbers<[1], [1], [0], [0], [0, 0, 1, 0], [], []>} : vector<8x12xbf16>, vector<256x12xbf16>, vector<8x256xf32> -> vector<8x256xf32>
    %33 = arith.addf %22, %32 : vector<8x256xf32>
    %c0_12 = arith.constant 0 : index
    %c0_13 = arith.constant 0 : index
    %34 = vector.load %arg4[%c0_12, %c0_13] : memref<8x1xf32, #tpu.memory_space<vmem>>, vector<8x1xf32>
    %35 = vector.broadcast %34 : vector<8x1xf32> to vector<8x256xf32>
    %36 = arith.addf %33, %35 : vector<8x256xf32>
    %cst_14 = arith.constant 0.000000e+00 : f32
    %37 = vector.broadcast %cst_14 : f32 to vector<8x256xf32>
    %38 = arith.maximumf %36, %37 : vector<8x256xf32>
    %c0_15 = arith.constant 0 : index
    %c0_16 = arith.constant 0 : index
    %c0_17 = arith.constant 0 : index
    %39 = vector.load %arg5[%c0_15, %c0_16, %c0_17] : memref<1x8x256xf32, #tpu.memory_space<vmem>>, vector<1x8x256xf32>
    %40 = vector.shape_cast %39 : vector<1x8x256xf32> to vector<8x256xf32>
    %41 = vector.shape_cast %38 : vector<8x256xf32> to vector<1x8x256xf32>
    tpu.vector_store %arg5[%c0_15, %c0_16, %c0_17], %41 {strides = array<i32>} : memref<1x8x256xf32, #tpu.memory_space<vmem>>, vector<1x8x256xf32>,
    return
  }
  func.func @transform_0(%arg0: i32, %arg1: i32) -> (i32, i32, i32, i32) {
    %c0_i32 = arith.constant 0 : i32
    %c0_i32_0 = arith.constant 0 : i32
    %c0_i32_1 = arith.constant 0 : i32
    %c0_i32_2 = arith.constant 0 : i32
    return %arg0, %c0_i32, %c0_i32_0, %c0_i32_1 : i32, i32, i32, i32
  }
  func.func @transform_1(%arg0: i32, %arg1: i32) -> (i32, i32, i32) {
    %c0_i32 = arith.constant 0 : i32
    %c0_i32_0 = arith.constant 0 : i32
    %c0_i32_1 = arith.constant 0 : i32
    %c0_i32_2 = arith.constant 0 : i32
    return %c0_i32, %c0_i32_0, %c0_i32_1 : i32, i32, i32
  }
  func.func @transform_2(%arg0: i32, %arg1: i32) -> (i32, i32) {
    %c0_i32 = arith.constant 0 : i32
    %c0_i32_0 = arith.constant 0 : i32
    %c0_i32_1 = arith.constant 0 : i32
    return %c0_i32, %c0_i32_0 : i32, i32
  }
  func.func @transform_3(%arg0: i32, %arg1: i32) -> (i32, i32, i32) {
    %c0_i32 = arith.constant 0 : i32
    %c0_i32_0 = arith.constant 0 : i32
    return %arg0, %c0_i32, %arg1 : i32, i32, i32
  }
}

</mosaic_0001>

<bundles_post_ra>
// kernel: conv_relu_pallas.1
= control target key start
LH: loop header
LB: loop body
LE: loop exit
PB: predicated region body
PF: predicated region fallthrough
CT: control target
= control target key end

     0   :  { %s1727_s12 = smov 0   ;;  %s1729_s13 = smov 0   ;;  %s2385_s0 = inlined_call_operand.vmem [shape: bf16[2,18,18,4], index: 0, kind: input, shape index: {}]   ;;  %s2386_s1 = inlined_call_operand.vmem [shape: bf16[3,8,12], index: 1, kind: input, shape index: {}]   ;;  %s2387_s2 = inlined_call_operand.vmem [shape: f32[8,1], index: 2, kind: input, shape index: {}]   ;;  %s2388_s3 = inlined_call_operand.vmem [shape: f32[2,8,256], index: 3, kind: output, shape index: {}]  }
   0x1   :  { %s1731_s14 = smov 0  }
   0x2 LB: > { %s25_s15 = sadd.s32 1, %s1698_s13  ;;  %p1466_p0 = scmp.ge.s32.totalorder %s1702_s14, 1  ;;  %s1702_s14 = sphi %s1731_s14, %s13_s14   ;;  %s1698_s13 = sphi %s1729_s13, %s2394_s13   ;;  %s1694_s12 = sphi %s1727_s12, %s2393_s12  }
   0x3   : > { %p27_p1 = scmp.ge.s32.totalorder %s25_s15, 2  ;;  %p151_p2 = scmp.lt.s32.totalorder %s1702_s14, 3 }
   0x5   : > { %s2396_s15 = smov (%p27_p1, %s25_s15), 0  ;;  %p152_p3 = pnand %p1466_p0, %p151_p2 }
   0x6   : > { %p179_p4 = scmp.lt.s32.totalorder (!%p152_p3), %s1694_s12, 1  ;;  %vm684_vm0 = vcmask (!%p152_p3), 1042432   ;;  %vm685_vm1 = vcmask (!%p152_p3), 1046532   ;;  %vm249_vm3 = vsmask.f32 (!%p152_p3), 3328  ;;  %s1704_s20 = smov (!%p152_p3), 8  }
   0x7   : > { %155 = sbr.rel (%p152_p3) target bundleno = 529 (0x211), region = 32  ;;  %vm1753_vm2 = vmor (!%p152_p3), %vm684_vm0, %vm685_vm1  ;;  %vm250_vm4 = vsmask.f32 (!%p152_p3), 7440  ;;  %s1705_s21 = smov (!%p152_p3), 4   ;;  %vm1144_vm6 = vcmask (!%p152_p3), 97280   ;;  %vm1007_vm7 = vcmask (!%p152_p3), 31744  }
   0x8   : > { %vm1772_vm5 = vmor (!%p152_p3), %vm249_vm3, %vm250_vm4  ;;  %vm1056_vm8 = vcmask (!%p152_p3), 64512  }
   0xe   : > { %s2398_s12 = smov (!%p179_p4, %s1694_s12), 1 }
   0xf   : > { %s1628_s16 = smul.u32 216, %s2398_s12  ;;  %s1549_s30 = sshll.u32 %s2398_s12, 4 }
  0x10   : > { %s192_s6 = scalar_lea.vmem %s2388_s3, %s1549_s30 }
  0x11   : > { %s1751_s19 = scalar_lea.vmem %s2385_s0, %s1628_s16 }
  0x12   : > { %v198_v1 = vld [vmem:[%s1751_s19 + $0xc] sm:$0xf]  ;;  %v199_v2 = vld [vmem:[%s1751_s19 + $0x10] sm:$0xf]  ;;  %v200_v3 = vld [vmem:[%s1751_s19 + $0x14] sm:$0x1] }
  0x13   : > { %v1471_v4 = vrot.slane %v198_v1, 9  ;;  %v696_v5 = vrot.slane %v199_v2, 5  ;;  %v699_v6 = vrot.slane %v200_v3, 5  ;;  %v277_v7 = vshrl.u32 %v198_v1, 16  ;;  %v222_v12 = vld [vmem:[%s1751_s19 + $0x6c] sm:$0xf] }
  0x14   : > { %v280_v8 = vshll.u32 %v198_v1, 16  ;;  %v286_v9 = vshll.u32 %v199_v2, 16  ;;  %v290_v10 = vshrl.u32 %v199_v2, 16  ;;  %v296_v11 = vshll.u32 %v200_v3, 16  ;;  %v224_v16 = vld [vmem:[%s1751_s19 + $0x74] sm:$0x1] }
  0x15   : > { %v697_v13 = vsel %vm1753_vm2, %v1471_v4, %v696_v5  ;;  %v698_v14 = vrot.slane %v696_v5, 4  ;;  %v279_v15 = vrot.slane %v277_v7, 4  ;;  %v1479_v17 = vrot.slane %v222_v12, 9  ;;  %v223_v22 = vld [vmem:[%s1751_s19 + $0x70] sm:$0xf] }
  0x16   : > { %v282_v18 = vrot.slane %v280_v8, 5  ;;  %v288_v19 = vrot.slane %v286_v9, 5  ;;  %v292_v20 = vrot.slane %v290_v10, 4  ;;  %v298_v21 = vrot.slane %v296_v11, 5  ;;  %v1768_v31 = vld [vmem:[%s1751_s19 + $0x78] sm:$0xf] }
  0x17   : > { %v700_v23 = vsel %vm1753_vm2, %v698_v14, %v699_v6  ;;  %v752_v24 = vrot.slane %v223_v22, 5  ;;  %v755_v25 = vrot.slane %v224_v16, 5  ;;  %v469_v26 = vshrl.u32 %v222_v12, 16  ;;  %v1782_v44 = vld [vmem:[%s1751_s19 + $0x7c] sm:$0xf] }
  0x18   : > { %v1519_v27 = vcombine.low %v697_v13, %v700_v23  ;;  %v283_v28 = vor.u32 %v282_v18, %v279_v15  ;;  %v293_v29 = vor.u32 %v292_v20, %v288_v19  ;;  %v472_v30 = vshll.u32 %v222_v12, 16  ;;  %v1790_v50 = vld [vmem:[%s1751_s19 + $0x80] sm:$0x1]  ;;  %v1793_v51 = vld [vmem:[%s1751_s19 + $0x18] sm:$0xf] }
  0x19   : > { %v753_v33 = vsel %vm1753_vm2, %v1479_v17, %v752_v24  ;;  %v754_v34 = vrot.slane %v752_v24, 4  ;;  %v471_v35 = vrot.slane %v469_v26, 4  ;;  %v478_v36 = vshll.u32 %v223_v22, 16  ;;  %v1802_v62 = vld [vmem:[%s1751_s19 + $0x1c] sm:$0xf] }
  0x1a   : > { %977 = vrot.lane.b32.xlu1 %v1519_v27, %s1704_s20  ;;  %v284_v37 = vrot.slane %v283_v28, 4  ;;  %v294_v38 = vrot.slane %v293_v29, 4  ;;  %v474_v39 = vrot.slane %v472_v30, 5  ;;  %v482_v40 = vshrl.u32 %v223_v22, 16  ;;  %v203_v6 = vld [vmem:[%s1751_s19 + $0x20] sm:$0x1] }
  0x1b   : > { %v756_v41 = vsel %vm1753_vm2, %v754_v34, %v755_v25  ;;  %v480_v42 = vrot.slane %v478_v36, 5  ;;  %v488_v43 = vshll.u32 %v224_v16, 16  ;;  %v493_v45 = vshrl.u32 %v1768_v31, 16  ;;  %v1816_v27 = vld [vmem:[%s1751_s19 + $0x84] sm:$0xf] }
  0x1c   : > { %v289_v46 = vsel %vm1772_vm5, %v284_v37, %v288_v19  ;;  %v299_v47 = vsel %vm1772_vm5, %v294_v38, %v298_v21  ;;  %v1527_v48 = vcombine.low %v753_v33, %v756_v41  ;;  %v475_v49 = vor.u32 %v474_v39, %v471_v35  ;;  %v1826_v33 = vld [vmem:[%s1751_s19 + $0x88] sm:$0xf] }
  0x1d   : > { %v1503_v52 = vcombine.low %v289_v46, %v299_v47  ;;  %v484_v53 = vrot.slane %v482_v40, 4  ;;  %v490_v54 = vrot.slane %v488_v43, 5  ;;  %v495_v55 = vrot.slane %v493_v45, 4  ;;  %v230_v43 = vld [vmem:[%s1751_s19 + $0x8c] sm:$0x1] }
  0x1e   : > { %993 = vrot.lane.b32.xlu1 %v1527_v48, %s1704_s20  ;;  %v476_v56 = vrot.slane %v475_v49, 4  ;;  %v496_v57 = vshll.u32 %v1768_v31, 16  ;;  %v502_v58 = vshll.u32 %v1782_v44, 16  ;;  %v506_v59 = vshrl.u32 %v1782_v44, 16 }
  0x1f   : > { %897 = vrot.lane.b32.xlu0 %v1503_v52, %s1705_s21  ;;  %v485_v60 = vor.u32 %v484_v53, %v480_v42  ;;  %v512_v61 = vshll.u32 %v1790_v50, 16  ;;  %v301_v63 = vshrl.u32 %v1793_v51, 16  ;;  %v304_v1 = vshll.u32 %v1793_v51, 16  ;;  %v1844_v53 = vld [vmem:[%s1751_s19 + $0x24] sm:$0xf] }
  0x20   : > { %v481_v2 = vsel %vm1772_vm5, %v476_v56, %v480_v42  ;;  %v498_v3 = vrot.slane %v496_v57, 5  ;;  %v504_v4 = vrot.slane %v502_v58, 5  ;;  %v508_v5 = vrot.slane %v506_v59, 4  ;;  %v1849_v58 = vld [vmem:[%s1751_s19 + $0x28] sm:$0xf] }
  0x21   : > { %v486_v7 = vrot.slane %v485_v60, 4  ;;  %v514_v8 = vrot.slane %v512_v61, 5  ;;  %v303_v9 = vrot.slane %v301_v63, 4  ;;  %v306_v10 = vrot.slane %v304_v1, 5  ;;  %v206_v1 = vld [vmem:[%s1751_s19 + $0x2c] sm:$0x1] }
  0x22   : > { %v499_v11 = vor.u32 %v498_v3, %v495_v55  ;;  %v509_v12 = vor.u32 %v508_v5, %v504_v4  ;;  %v310_v13 = vshll.u32 %v1802_v62, 16  ;;  %v314_v14 = vshrl.u32 %v1802_v62, 16 }
  0x23   : > { %v491_v15 = vsel %vm1772_vm5, %v486_v7, %v490_v54  ;;  %v307_v16 = vor.u32 %v306_v10, %v303_v9  ;;  %v320_v17 = vshll.u32 %v203_v6, 16  ;;  %v1480_v18 = vrot.slane %v1768_v31, 9 }
  0x24   : > { %v1511_v19 = vcombine.low %v481_v2, %v491_v15  ;;  %v500_v20 = vrot.slane %v499_v11, 4  ;;  %v510_v21 = vrot.slane %v509_v12, 4  ;;  %v312_v22 = vrot.slane %v310_v13, 5 }
  0x25   : > { %v308_v23 = vrot.slane %v307_v16, 4  ;;  %v316_v24 = vrot.slane %v314_v14, 4  ;;  %v322_v25 = vrot.slane %v320_v17, 5  ;;  %v759_v26 = vrot.slane %v1782_v44, 5 }
  0x26   : > { %913 = vrot.lane.b32.xlu0 %v1511_v19, %s1705_s21  ;;  %v505_v28 = vsel %vm1772_vm5, %v500_v20, %v504_v4  ;;  %v515_v29 = vsel %vm1772_vm5, %v510_v21, %v514_v8  ;;  %v762_v30 = vrot.slane %v1790_v50, 5  ;;  %v1472_v31 = vrot.slane %v1793_v51, 9 }
  0x27   : > { %v1512_v34 = vcombine.low %v505_v28, %v515_v29  ;;  %v313_v35 = vsel %vm1772_vm5, %v308_v23, %v312_v22  ;;  %v317_v36 = vor.u32 %v316_v24, %v312_v22  ;;  %v760_v37 = vsel %vm1753_vm2, %v1480_v18, %v759_v26  ;;  %v1865_v22 = vld [vmem:[%s1751_s19 + $0x90] sm:$0xf]  ;;  %v1872_v28 = vld [vmem:[%s1751_s19 + $0x94] sm:$0xf] }
  0x28   : > { %v761_v38 = vrot.slane %v759_v26, 4  ;;  %v703_v39 = vrot.slane %v1802_v62, 5  ;;  %v706_v40 = vrot.slane %v203_v6, 5  ;;  %v517_v41 = vshrl.u32 %v1816_v27, 16 }
  0x29   : > { %915 = vrot.lane.b32.xlu1 %v1512_v34, %s1705_s21  ;;  %v318_v42 = vrot.slane %v317_v36, 4  ;;  %v520_v45 = vshll.u32 %v1816_v27, 16  ;;  %v526_v46 = vshll.u32 %v1826_v33, 16  ;;  %v530_v47 = vshrl.u32 %v1826_v33, 16 }
  0x2a   : > { %v763_v48 = vsel %vm1753_vm2, %v761_v38, %v762_v30  ;;  %v704_v49 = vsel %vm1753_vm2, %v1472_v31, %v703_v39  ;;  %v705_v50 = vrot.slane %v703_v39, 4  ;;  %v519_v52 = vrot.slane %v517_v41, 4  ;;  %v233_v41 = vld [vmem:[%s1751_s19 + $0x98] sm:$0x1] }
  0x2b   : > { %v323_v54 = vsel %vm1772_vm5, %v318_v42, %v322_v25  ;;  %v1528_v55 = vcombine.low %v760_v37, %v763_v48  ;;  %v522_v56 = vrot.slane %v520_v45, 5  ;;  %v528_v57 = vrot.slane %v526_v46, 5  ;;  %v1887_v45 = vld [vmem:[%s1751_s19 + $0x30] sm:$0xf] }
  0x2c   : > { %v1504_v59 = vcombine.low %v313_v35, %v323_v54  ;;  %v707_v60 = vsel %vm1753_vm2, %v705_v50, %v706_v40  ;;  %v532_v61 = vrot.slane %v530_v47, 4  ;;  %v536_v63 = vshll.u32 %v230_v43, 16  ;;  %v1894_v50 = vld [vmem:[%s1751_s19 + $0x34] sm:$0xf] }
  0x2d   : > { %995 = vrot.lane.b32.xlu1 %v1528_v55, %s1704_s20  ;;  %v1520_v2 = vcombine.low %v704_v49, %v707_v60  ;;  %v523_v3 = vor.u32 %v522_v56, %v519_v52  ;;  %v325_v4 = vshrl.u32 %v1844_v53, 16  ;;  %v328_v5 = vshll.u32 %v1844_v53, 16 }
  0x2e   : > { %899 = vrot.lane.b32.xlu0 %v1504_v59, %s1705_s21  ;;  %v533_v6 = vor.u32 %v532_v61, %v528_v57  ;;  %v538_v7 = vrot.slane %v536_v63, 5  ;;  %v334_v8 = vshll.u32 %v1849_v58, 16  ;;  %v338_v9 = vshrl.u32 %v1849_v58, 16  ;;  %v209_v61 = vld [vmem:[%s1751_s19 + $0x38] sm:$0x1] }
  0x2f   : > { %v524_v10 = vrot.slane %v523_v3, 4  ;;  %v327_v11 = vrot.slane %v325_v4, 4  ;;  %v330_v12 = vrot.slane %v328_v5, 5  ;;  %v344_v13 = vshll.u32 %v206_v1, 16 }
  0x30   : > { %v534_v14 = vrot.slane %v533_v6, 4  ;;  %v336_v15 = vrot.slane %v334_v8, 5  ;;  %v340_v16 = vrot.slane %v338_v9, 4  ;;  %v1481_v17 = vrot.slane %v1816_v27, 9 }
  0x31   : > { %v529_v18 = vsel %vm1772_vm5, %v524_v10, %v528_v57  ;;  %v331_v19 = vor.u32 %v330_v12, %v327_v11  ;;  %v346_v20 = vrot.slane %v344_v13, 5  ;;  %v766_v21 = vrot.slane %v1826_v33, 5 }
  0x32   : > { %979 = vrot.lane.b32.xlu0 %v1520_v2, %s1704_s20  ;;  %v539_v23 = vsel %vm1772_vm5, %v534_v14, %v538_v7  ;;  %v341_v24 = vor.u32 %v340_v16, %v336_v15  ;;  %v769_v25 = vrot.slane %v230_v43, 5  ;;  %v1473_v26 = vrot.slane %v1844_v53, 9 }
  0x33   : > { %v1513_v29 = vcombine.low %v529_v18, %v539_v23  ;;  %v332_v30 = vrot.slane %v331_v19, 4  ;;  %v767_v31 = vsel %vm1753_vm2, %v1481_v17, %v766_v21  ;;  %v768_v34 = vrot.slane %v766_v21, 4  ;;  %v1912_v21 = vld [vmem:[%s1751_s19 + $0x9c] sm:$0xf] }
  0x34   : > { %v342_v35 = vrot.slane %v341_v24, 4  ;;  %v710_v36 = vrot.slane %v1849_v58, 5  ;;  %v713_v37 = vrot.slane %v206_v1, 5  ;;  %v541_v38 = vshrl.u32 %v1865_v22, 16 }
  0x35   : > { %917 = vrot.lane.b32.xlu1 %v1513_v29, %s1705_s21  ;;  %v337_v39 = vsel %vm1772_vm5, %v332_v30, %v336_v15  ;;  %v770_v40 = vsel %vm1753_vm2, %v768_v34, %v769_v25  ;;  %v544_v42 = vshll.u32 %v1865_v22, 16  ;;  %v550_v43 = vshll.u32 %v1872_v28, 16 }
  0x36   : > { %v347_v46 = vsel %vm1772_vm5, %v342_v35, %v346_v20  ;;  %v1529_v47 = vcombine.low %v767_v31, %v770_v40  ;;  %v711_v48 = vsel %vm1753_vm2, %v1473_v26, %v710_v36  ;;  %v712_v49 = vrot.slane %v710_v36, 4 }
  0x37   : > { %v1505_v52 = vcombine.low %v337_v39, %v347_v46  ;;  %v543_v54 = vrot.slane %v541_v38, 4  ;;  %v546_v55 = vrot.slane %v544_v42, 5  ;;  %v552_v56 = vrot.slane %v550_v43, 5  ;;  %v1923_v38 = vld [vmem:[%s1751_s19 + $0xa0] sm:$0xf] }
  0x38   : > { %v714_v57 = vsel %vm1753_vm2, %v712_v49, %v713_v37  ;;  %v554_v59 = vshrl.u32 %v1872_v28, 16  ;;  %v560_v60 = vshll.u32 %v233_v41, 16  ;;  %v349_v63 = vshrl.u32 %v1887_v45, 16  ;;  %v236_v39 = vld [vmem:[%s1751_s19 + $0xa4] sm:$0x1] }
  0x39   : > { %901 = vrot.lane.b32.xlu0 %v1505_v52, %s1705_s21  ;;  %997 = vrot.lane.b32.xlu1 %v1529_v47, %s1704_s20  ;;  %v1521_v1 = vcombine.low %v711_v48, %v714_v57  ;;  %v547_v2 = vor.u32 %v546_v55, %v543_v54  ;;  %v352_v3 = vshll.u32 %v1887_v45, 16  ;;  %v358_v4 = vshll.u32 %v1894_v50, 16  ;;  %v1932_v47 = vld [vmem:[%s1751_s19 + $0x3c] sm:$0xf] }
  0x3a   : > { %v556_v5 = vrot.slane %v554_v59, 4  ;;  %v562_v6 = vrot.slane %v560_v60, 5  ;;  %v351_v7 = vrot.slane %v349_v63, 4  ;;  %v362_v8 = vshrl.u32 %v1894_v50, 16  ;;  %v1941_v60 = vld [vmem:[%s1751_s19 + $0x40] sm:$0xf] }
  0x3b   : > { %v548_v9 = vrot.slane %v547_v2, 4  ;;  %v354_v10 = vrot.slane %v352_v3, 5  ;;  %v360_v11 = vrot.slane %v358_v4, 5  ;;  %v368_v12 = vshll.u32 %v209_v61, 16 }
  0x3c   : > { %v557_v13 = vor.u32 %v556_v5, %v552_v56  ;;  %v364_v14 = vrot.slane %v362_v8, 4  ;;  %v1482_v15 = vrot.slane %v1865_v22, 9  ;;  %v773_v16 = vrot.slane %v1872_v28, 5 }
  0x3d   : > { %981 = vrot.lane.b32.xlu0 %v1521_v1, %s1704_s20  ;;  %v553_v17 = vsel %vm1772_vm5, %v548_v9, %v552_v56  ;;  %v355_v18 = vor.u32 %v354_v10, %v351_v7  ;;  %v370_v19 = vrot.slane %v368_v12, 5  ;;  %v776_v20 = vrot.slane %v233_v41, 5  ;;  %v212_v1 = vld [vmem:[%s1751_s19 + $0x44] sm:$0x1] }
  0x3e   : > { %v558_v23 = vrot.slane %v557_v13, 4  ;;  %v365_v24 = vor.u32 %v364_v14, %v360_v11  ;;  %v774_v25 = vsel %vm1753_vm2, %v1482_v15, %v773_v16  ;;  %v775_v26 = vrot.slane %v773_v16, 4 }
  0x3f   : > { %v356_v29 = vrot.slane %v355_v18, 4  ;;  %v1474_v30 = vrot.slane %v1887_v45, 9  ;;  %v717_v31 = vrot.slane %v1894_v50, 5  ;;  %v720_v34 = vrot.slane %v209_v61, 5 }
  0x40   : > { %v563_v35 = vsel %vm1772_vm5, %v558_v23, %v562_v6  ;;  %v366_v36 = vrot.slane %v365_v24, 4  ;;  %v777_v37 = vsel %vm1753_vm2, %v775_v26, %v776_v20  ;;  %v565_v40 = vshrl.u32 %v1912_v21, 16 }
  0x41   : > { %v1514_v41 = vcombine.low %v553_v17, %v563_v35  ;;  %v361_v42 = vsel %vm1772_vm5, %v356_v29, %v360_v11  ;;  %v1530_v43 = vcombine.low %v774_v25, %v777_v37  ;;  %v718_v46 = vsel %vm1753_vm2, %v1474_v30, %v717_v31 }
  0x42   : > { %v371_v48 = vsel %vm1772_vm5, %v366_v36, %v370_v19  ;;  %v719_v49 = vrot.slane %v717_v31, 4  ;;  %v567_v52 = vrot.slane %v565_v40, 4  ;;  %v568_v54 = vshll.u32 %v1912_v21, 16  ;;  %v1964_v40 = vld [vmem:[%s1751_s19 + $0xa8] sm:$0xf] }
  0x43   : > { %919 = vrot.lane.b32.xlu1 %v1514_v41, %s1705_s21  ;;  %v1506_v55 = vcombine.low %v361_v42, %v371_v48  ;;  %v574_v56 = vshll.u32 %v1923_v38, 16  ;;  %v578_v57 = vshrl.u32 %v1923_v38, 16  ;;  %v584_v59 = vshll.u32 %v236_v39, 16  ;;  %v239_v48 = vld [vmem:[%s1751_s19 + $0xb0] sm:$0x1] }
  0x44   : > { %v721_v61 = vsel %vm1753_vm2, %v719_v49, %v720_v34  ;;  %v570_v63 = vrot.slane %v568_v54, 5  ;;  %v373_v2 = vshrl.u32 %v1932_v47, 16  ;;  %v376_v3 = vshll.u32 %v1932_v47, 16  ;;  %v1975_v49 = vld [vmem:[%s1751_s19 + $0x48] sm:$0xf] }
  0x45   : > { %903 = vrot.lane.b32.xlu0 %v1506_v55, %s1705_s21  ;;  %v1522_v4 = vcombine.low %v718_v46, %v721_v61  ;;  %v576_v5 = vrot.slane %v574_v56, 5  ;;  %v580_v6 = vrot.slane %v578_v57, 4  ;;  %v586_v7 = vrot.slane %v584_v59, 5 }
  0x46   : > { %v571_v8 = vor.u32 %v570_v63, %v567_v52  ;;  %v375_v9 = vrot.slane %v373_v2, 4  ;;  %v378_v10 = vrot.slane %v376_v3, 5  ;;  %v382_v11 = vshll.u32 %v1941_v60, 16 }
  0x47   : > { %999 = vrot.lane.b32.xlu1 %v1530_v43, %s1704_s20  ;;  %v581_v12 = vor.u32 %v580_v6, %v576_v5  ;;  %v386_v13 = vshrl.u32 %v1941_v60, 16  ;;  %v392_v14 = vshll.u32 %v212_v1, 16  ;;  %v1483_v15 = vrot.slane %v1912_v21, 9 }
  0x48   : > { %v572_v16 = vrot.slane %v571_v8, 4  ;;  %v379_v17 = vor.u32 %v378_v10, %v375_v9  ;;  %v384_v18 = vrot.slane %v382_v11, 5  ;;  %v780_v19 = vrot.slane %v1923_v38, 5  ;;  %v215_v10 = vld [vmem:[%s1751_s19 + $0x50] sm:$0x1] }
  0x49   : > { %983 = vrot.lane.b32.xlu0 %v1522_v4, %s1704_s20  ;;  %v582_v20 = vrot.slane %v581_v12, 4  ;;  %v388_v23 = vrot.slane %v386_v13, 4  ;;  %v394_v24 = vrot.slane %v392_v14, 5  ;;  %v783_v25 = vrot.slane %v236_v39, 5  ;;  %v1967_v39 = vld [vmem:[%s1751_s19 + $0xac] sm:$0xf] }
  0x4a   : > { %v577_v26 = vsel %vm1772_vm5, %v572_v16, %v576_v5  ;;  %v380_v29 = vrot.slane %v379_v17, 4  ;;  %v781_v30 = vsel %vm1753_vm2, %v1483_v15, %v780_v19  ;;  %v782_v31 = vrot.slane %v780_v19, 4  ;;  %v1989_v4 = vld [vmem:[%s1751_s19 + $0x4c] sm:$0xf] }
  0x4b   : > { %v587_v34 = vsel %vm1772_vm5, %v582_v20, %v586_v7  ;;  %v389_v35 = vor.u32 %v388_v23, %v384_v18  ;;  %v1475_v36 = vrot.slane %v1932_v47, 9  ;;  %v724_v37 = vrot.slane %v1941_v60, 5 }
  0x4c   : > { %v1515_v41 = vcombine.low %v577_v26, %v587_v34  ;;  %v385_v42 = vsel %vm1772_vm5, %v380_v29, %v384_v18  ;;  %v784_v43 = vsel %vm1753_vm2, %v782_v31, %v783_v25  ;;  %v727_v46 = vrot.slane %v212_v1, 5 }
  0x4d   : > { %v390_v52 = vrot.slane %v389_v35, 4  ;;  %v1531_v54 = vcombine.low %v781_v30, %v784_v43  ;;  %v725_v55 = vsel %vm1753_vm2, %v1475_v36, %v724_v37  ;;  %v726_v56 = vrot.slane %v724_v37, 4 }
  0x4e   : > { %921 = vrot.lane.b32.xlu1 %v1515_v41, %s1705_s21  ;;  %v589_v57 = vshrl.u32 %v1964_v40, 16  ;;  %v592_v59 = vshll.u32 %v1964_v40, 16  ;;  %v598_v61 = vshll.u32 %v1967_v39, 16  ;;  %v602_v63 = vshrl.u32 %v1967_v39, 16 }
  0x4f   : > { %v395_v1 = vsel %vm1772_vm5, %v390_v52, %v394_v24  ;;  %v728_v2 = vsel %vm1753_vm2, %v726_v56, %v727_v46  ;;  %v608_v3 = vshll.u32 %v239_v48, 16  ;;  %v397_v5 = vshrl.u32 %v1975_v49, 16  ;;  %v2006_v46 = vld [vmem:[%s1751_s19 + $0xb4] sm:$0xf] }
  0x50   : > { %v1507_v6 = vcombine.low %v385_v42, %v395_v1  ;;  %v1523_v7 = vcombine.low %v725_v55, %v728_v2  ;;  %v591_v8 = vrot.slane %v589_v57, 4  ;;  %v594_v9 = vrot.slane %v592_v59, 5  ;;  %v2013_v57 = vld [vmem:[%s1751_s19 + $0xb8] sm:$0xf] }
  0x51   : > { %v600_v11 = vrot.slane %v598_v61, 5  ;;  %v604_v12 = vrot.slane %v602_v63, 4  ;;  %v610_v13 = vrot.slane %v608_v3, 5  ;;  %v399_v14 = vrot.slane %v397_v5, 4  ;;  %v242_v5 = vld [vmem:[%s1751_s19 + $0xbc] sm:$0x1] }
  0x52   : > { %905 = vrot.lane.b32.xlu0 %v1507_v6, %s1705_s21  ;;  %1001 = vrot.lane.b32.xlu1 %v1531_v54, %s1704_s20  ;;  %v595_v15 = vor.u32 %v594_v9, %v591_v8  ;;  %v400_v16 = vshll.u32 %v1975_v49, 16  ;;  %v406_v17 = vshll.u32 %v1989_v4, 16  ;;  %v410_v18 = vshrl.u32 %v1989_v4, 16 }
  0x53   : > { %v605_v19 = vor.u32 %v604_v12, %v600_v11  ;;  %v416_v20 = vshll.u32 %v215_v10, 16  ;;  %v1484_v23 = vrot.slane %v1964_v40, 9  ;;  %v787_v24 = vrot.slane %v1967_v39, 5  ;;  %v2032_v12 = vld [vmem:[%s1751_s19 + $0x58] sm:$0xf] }
  0x54   : > { %v596_v25 = vrot.slane %v595_v15, 4  ;;  %v402_v26 = vrot.slane %v400_v16, 5  ;;  %v408_v29 = vrot.slane %v406_v17, 5  ;;  %v412_v30 = vrot.slane %v410_v18, 4  ;;  %v218_v17 = vld [vmem:[%s1751_s19 + $0x5c] sm:$0x1] }
  0x55   : > { %v606_v31 = vrot.slane %v605_v19, 4  ;;  %v418_v34 = vrot.slane %v416_v20, 5  ;;  %v788_v35 = vsel %vm1753_vm2, %v1484_v23, %v787_v24  ;;  %v789_v36 = vrot.slane %v787_v24, 4 }
  0x56   : > { %985 = vrot.lane.b32.xlu0 %v1523_v7, %s1704_s20  ;;  %v601_v37 = vsel %vm1772_vm5, %v596_v25, %v600_v11  ;;  %v403_v41 = vor.u32 %v402_v26, %v399_v14  ;;  %v413_v42 = vor.u32 %v412_v30, %v408_v29  ;;  %v790_v43 = vrot.slane %v239_v48, 5  ;;  %v2029_v11 = vld [vmem:[%s1751_s19 + $0x54] sm:$0xf] }
  0x57   : > { %v611_v52 = vsel %vm1772_vm5, %v606_v31, %v610_v13  ;;  %v1476_v54 = vrot.slane %v1975_v49, 9  ;;  %v731_v55 = vrot.slane %v1989_v4, 5  ;;  %v734_v56 = vrot.slane %v215_v10, 5 }
  0x58   : > { %v1516_v59 = vcombine.low %v601_v37, %v611_v52  ;;  %v404_v61 = vrot.slane %v403_v41, 4  ;;  %v414_v63 = vrot.slane %v413_v42, 4  ;;  %v791_v48 = vsel %vm1753_vm2, %v789_v36, %v790_v43 }
  0x59   : > { %v1532_v1 = vcombine.low %v788_v35, %v791_v48  ;;  %v732_v2 = vsel %vm1753_vm2, %v1476_v54, %v731_v55  ;;  %v733_v3 = vrot.slane %v731_v55, 4  ;;  %v613_v6 = vshrl.u32 %v2006_v46, 16 }
  0x5a   : > { %923 = vrot.lane.b32.xlu1 %v1516_v59, %s1705_s21  ;;  %v409_v7 = vsel %vm1772_vm5, %v404_v61, %v408_v29  ;;  %v419_v8 = vsel %vm1772_vm5, %v414_v63, %v418_v34  ;;  %v616_v9 = vshll.u32 %v2006_v46, 16  ;;  %v622_v10 = vshll.u32 %v2013_v57, 16 }
  0x5b   : > { %v1508_v13 = vcombine.low %v409_v7, %v419_v8  ;;  %v735_v14 = vsel %vm1753_vm2, %v733_v3, %v734_v56  ;;  %v615_v15 = vrot.slane %v613_v6, 4  ;;  %v626_v16 = vshrl.u32 %v2013_v57, 16  ;;  %v2052_v6 = vld [vmem:[%s1751_s19 + $0xc0] sm:$0xf] }
  0x5c   : > { %v1524_v18 = vcombine.low %v732_v2, %v735_v14  ;;  %v618_v19 = vrot.slane %v616_v9, 5  ;;  %v624_v20 = vrot.slane %v622_v10, 5  ;;  %v632_v23 = vshll.u32 %v242_v5, 16 }
  0x5d   : > { %907 = vrot.lane.b32.xlu0 %v1508_v13, %s1705_s21  ;;  %v628_v24 = vrot.slane %v626_v16, 4  ;;  %v421_v25 = vshrl.u32 %v2029_v11, 16  ;;  %v424_v26 = vshll.u32 %v2029_v11, 16  ;;  %v430_v29 = vshll.u32 %v2032_v12, 16 }
  0x5e   : > { %1003 = vrot.lane.b32.xlu1 %v1532_v1, %s1704_s20  ;;  %v619_v30 = vor.u32 %v618_v19, %v615_v15  ;;  %v634_v31 = vrot.slane %v632_v23, 5  ;;  %v434_v34 = vshrl.u32 %v2032_v12, 16  ;;  %v440_v35 = vshll.u32 %v218_v17, 16  ;;  %v245_v23 = vld [vmem:[%s1751_s19 + $0xc8] sm:$0x1] }
  0x5f   : > { %v629_v36 = vor.u32 %v628_v24, %v624_v20  ;;  %v423_v37 = vrot.slane %v421_v25, 4  ;;  %v426_v41 = vrot.slane %v424_v26, 5  ;;  %v432_v42 = vrot.slane %v430_v29, 5 }
  0x60   : > { %v620_v43 = vrot.slane %v619_v30, 4  ;;  %v436_v52 = vrot.slane %v434_v34, 4  ;;  %v442_v54 = vrot.slane %v440_v35, 5  ;;  %v1485_v55 = vrot.slane %v2006_v46, 9  ;;  %v2078_v34 = vld [vmem:[%s1751_s19 + $0x64] sm:$0xf] }
  0x61   : > { %987 = vrot.lane.b32.xlu0 %v1524_v18, %s1704_s20  ;;  %v630_v56 = vrot.slane %v629_v36, 4  ;;  %v427_v59 = vor.u32 %v426_v41, %v423_v37  ;;  %v794_v61 = vrot.slane %v2013_v57, 5  ;;  %v797_v63 = vrot.slane %v242_v5, 5  ;;  %v2059_v5 = vld [vmem:[%s1751_s19 + $0xc4] sm:$0xf] }
  0x62   : > { %v625_v48 = vsel %vm1772_vm5, %v620_v43, %v624_v20  ;;  %v437_v1 = vor.u32 %v436_v52, %v432_v42  ;;  %v1477_v2 = vrot.slane %v2029_v11, 9  ;;  %v738_v3 = vrot.slane %v2032_v12, 5  ;;  %v221_v41 = vld [vmem:[%s1751_s19 + $0x68] sm:$0x1] }
  0x63   : > { %v635_v7 = vsel %vm1772_vm5, %v630_v56, %v634_v31  ;;  %v428_v8 = vrot.slane %v427_v59, 4  ;;  %v795_v9 = vsel %vm1753_vm2, %v1485_v55, %v794_v61  ;;  %v796_v10 = vrot.slane %v794_v61, 4  ;;  %v2075_v31 = vld [vmem:[%s1751_s19 + $0x60] sm:$0xf] }
  0x64   : > { %v1517_v13 = vcombine.low %v625_v48, %v635_v7  ;;  %v438_v14 = vrot.slane %v437_v1, 4  ;;  %v739_v15 = vsel %vm1753_vm2, %v1477_v2, %v738_v3  ;;  %v740_v16 = vrot.slane %v738_v3, 4 }
  0x65   : > { %v433_v18 = vsel %vm1772_vm5, %v428_v8, %v432_v42  ;;  %v798_v19 = vsel %vm1753_vm2, %v796_v10, %v797_v63  ;;  %v741_v20 = vrot.slane %v218_v17, 5  ;;  %v1091_v24 = vshrl.u32 %v2052_v6, 16 }
  0x66   : > { %925 = vrot.lane.b32.xlu1 %v1517_v13, %s1705_s21  ;;  %v443_v25 = vsel %vm1772_vm5, %v438_v14, %v442_v54  ;;  %v1533_v26 = vcombine.low %v795_v9, %v798_v19  ;;  %v1094_v29 = vshll.u32 %v2052_v6, 16  ;;  %v1100_v30 = vshll.u32 %v2059_v5, 16 }
  0x67   : > { %v1509_v35 = vcombine.low %v433_v18, %v443_v25  ;;  %v742_v17 = vsel %vm1753_vm2, %v740_v16, %v741_v20  ;;  %v1093_v36 = vrot.slane %v1091_v24, 4  ;;  %v1104_v37 = vshrl.u32 %v2059_v5, 16 }
  0x68   : > { %v1525_v42 = vcombine.low %v739_v15, %v742_v17  ;;  %v1096_v43 = vrot.slane %v1094_v29, 5  ;;  %v1102_v52 = vrot.slane %v1100_v30, 5  ;;  %v1110_v54 = vshll.u32 %v245_v23, 16  ;;  %v2098_v30 = vld [vmem:[%s1751_s19] sm:$0xf] }
  0x69   : > { %909 = vrot.lane.b32.xlu0 %v1509_v35, %s1705_s21  ;;  %v1106_v55 = vrot.slane %v1104_v37, 4  ;;  %v445_v56 = vshrl.u32 %v2075_v31, 16  ;;  %v448_v59 = vshll.u32 %v2075_v31, 16  ;;  %v454_v61 = vshll.u32 %v2078_v34, 16 }
  0x6a   : > { %1005 = vrot.lane.b32.xlu1 %v1533_v26, %s1704_s20  ;;  %v1097_v63 = vor.u32 %v1096_v43, %v1093_v36  ;;  %v1112_v48 = vrot.slane %v1110_v54, 5  ;;  %v458_v1 = vshrl.u32 %v2078_v34, 16  ;;  %v464_v2 = vshll.u32 %v221_v41, 16 }
  0x6b   : > { %v1107_v3 = vor.u32 %v1106_v55, %v1102_v52  ;;  %v447_v7 = vrot.slane %v445_v56, 4  ;;  %v450_v8 = vrot.slane %v448_v59, 5  ;;  %v456_v9 = vrot.slane %v454_v61, 5  ;;  %v197_v61 = vld [vmem:[%s1751_s19 + $0x8] sm:$0x1] }
  0x6c   : > { %v1098_v10 = vrot.slane %v1097_v63, 4  ;;  %v460_v13 = vrot.slane %v458_v1, 4  ;;  %v466_v14 = vrot.slane %v464_v2, 5  ;;  %v1534_v15 = vrot.slane %v2052_v6, 9 }
  0x6d   : > { %989 = vrot.lane.b32.xlu0 %v1525_v42, %s1704_s20  ;;  %v1108_v16 = vrot.slane %v1107_v3, 4  ;;  %v451_v18 = vor.u32 %v450_v8, %v447_v7  ;;  %v1119_v19 = vrot.slane %v2059_v5, 5  ;;  %v1122_v20 = vrot.slane %v245_v23, 5  ;;  %v2105_v23 = vld [vmem:[%s1751_s19 + $0x4] sm:$0xf] }
  0x6e   : > { %v1103_v24 = vsel %vm1772_vm5, %v1098_v10, %v1102_v52  ;;  %v461_v25 = vor.u32 %v460_v13, %v456_v9  ;;  %v1478_v26 = vrot.slane %v2075_v31, 9  ;;  %v745_v29 = vrot.slane %v2078_v34, 5 }
  0x6f   : > { %v1113_v35 = vsel %vm1772_vm5, %v1108_v16, %v1112_v48  ;;  %v452_v17 = vrot.slane %v451_v18, 4  ;;  %v1120_v36 = vsel %vm1753_vm2, %v1534_v15, %v1119_v19  ;;  %v1121_v37 = vrot.slane %v1119_v19, 4 }
  0x70   : > { %v1536_v42 = vcombine.low %v1103_v24, %v1113_v35  ;;  %v462_v43 = vrot.slane %v461_v25, 4  ;;  %v746_v52 = vsel %vm1753_vm2, %v1478_v26, %v745_v29  ;;  %v747_v54 = vrot.slane %v745_v29, 4  ;;  %v2128_v25 = vld [vmem:[%s1751_s19 + $0xcc] sm:$0xf]  ;;  %v2133_v26 = vld [vmem:[%s2386_s1 + $0x4] sm:$0xf] }
  0x71   : > { %v457_v55 = vsel %vm1772_vm5, %v452_v17, %v456_v9  ;;  %v1123_v56 = vsel %vm1753_vm2, %v1121_v37, %v1122_v20  ;;  %v748_v59 = vrot.slane %v221_v41, 5  ;;  %v253_v63 = vshrl.u32 %v2098_v30, 16  ;;  %v2138_v37 = vld [vmem:[%s1751_s19 + $0xd0] sm:$0xf]  ;;  %1566 = vmatprep.mubr.msk.bf16.mxu0 %vm1144_vm6, %v2133_v26 }
  0x72   : > { %1130 = vrot.lane.b32.xlu1 %v1536_v42, %s1705_s21  ;;  %v467_v48 = vsel %vm1772_vm5, %v462_v43, %v466_v14  ;;  %v1537_v1 = vcombine.low %v1120_v36, %v1123_v56  ;;  %v256_v2 = vshll.u32 %v2098_v30, 16  ;;  %v262_v3 = vshll.u32 %v2105_v23, 16  ;;  %v248_v43 = vld [vmem:[%s1751_s19 + $0xd4] sm:$0x1] }
  0x73   : > { %v1510_v7 = vcombine.low %v457_v55, %v467_v48  ;;  %v749_v8 = vsel %vm1753_vm2, %v747_v54, %v748_v59  ;;  %v255_v9 = vrot.slane %v253_v63, 4  ;;  %v266_v41 = vshrl.u32 %v2105_v23, 16 }
  0x74   : > { %v1526_v10 = vcombine.low %v746_v52, %v749_v8  ;;  %v258_v13 = vrot.slane %v256_v2, 5  ;;  %v264_v15 = vrot.slane %v262_v3, 5  ;;  %v272_v16 = vshll.u32 %v197_v61, 16 }
  0x75   : > { %911 = vrot.lane.b32.xlu0 %v1510_v7, %s1705_s21  ;;  %v268_v14 = vrot.slane %v266_v41, 4  ;;  %v1470_v18 = vrot.slane %v2098_v30, 9  ;;  %v689_v19 = vrot.slane %v2105_v23, 5  ;;  %v692_v20 = vrot.slane %v197_v61, 5 }
  0x76   : > { %1135 = vrot.lane.b32.xlu1 %v1537_v1, %s1704_s20  ;;  %v259_v24 = vor.u32 %v258_v13, %v255_v9  ;;  %v274_v35 = vrot.slane %v272_v16, 5  ;;  %v1268_v55 = vshrl.u32 %v2128_v25, 16  ;;  %v1271_v56 = vshll.u32 %v2128_v25, 16 }
  0x77   : > { %v269_v29 = vor.u32 %v268_v14, %v264_v15  ;;  %v690_v17 = vsel %vm1753_vm2, %v1470_v18, %v689_v19  ;;  %v691_v36 = vrot.slane %v689_v19, 4  ;;  %v1277_v63 = vshll.u32 %v2138_v37, 16 }
  0x78   : > { %v260_v42 = vrot.slane %v259_v24, 4  ;;  %v1281_v48 = vshrl.u32 %v2138_v37, 16  ;;  %v1270_v2 = vrot.slane %v1268_v55, 4  ;;  %v1273_v3 = vrot.slane %v1271_v56, 5 }
  0x79   : > { %991 = vrot.lane.b32.xlu0 %v1526_v10, %s1704_s20  ;;  %v270_v52 = vrot.slane %v269_v29, 4  ;;  %v693_v54 = vsel %vm1753_vm2, %v691_v36, %v692_v20  ;;  %v1287_v7 = vshll.u32 %v248_v43, 16  ;;  %v1279_v9 = vrot.slane %v1277_v63, 5 }
  0x7a   : > { %v265_v59 = vsel %vm1772_vm5, %v260_v42, %v264_v15  ;;  %v1518_v61 = vcombine.low %v690_v17, %v693_v54  ;;  %v1283_v41 = vrot.slane %v1281_v48, 4  ;;  %v1541_v10 = vrot.slane %v2128_v25, 9 }
  0x7b   : > { %v275_v1 = vsel %vm1772_vm5, %v270_v52, %v274_v35  ;;  %v1274_v13 = vor.u32 %v1273_v3, %v1270_v2  ;;  %v1296_v15 = vrot.slane %v2138_v37, 5  ;;  %v1299_v16 = vrot.slane %v248_v43, 5  ;;  %v1676_v2 = vld [vmem:[%s1751_s19 + $0x10] sm:$0xf] }
  0x7c   : > { %v1502_v8 = vcombine.low %v265_v59, %v275_v1  ;;  %975 = vrot.lane.b32.xlu1 %v1518_v61, %s1704_s20  ;;  %v1284_v14 = vor.u32 %v1283_v41, %v1279_v9  ;;  %v1289_v18 = vrot.slane %v1287_v7, 5  ;;  %v1499_v35 = vcombine.low %v1912_v21, %v1923_v38  ;;  %v1675_v1 = vld [vmem:[%s1751_s19 + $0xc] sm:$0xf] }
  0x7d   : > { %v1275_v19 = vrot.slane %v1274_v13, 4  ;;  %v1297_v20 = vsel %vm1753_vm2, %v1541_v10, %v1296_v15  ;;  %v1298_v24 = vrot.slane %v1296_v15, 4  ;;  %v1491_v17 = vcombine.low %v1932_v47, %v1941_v60  ;;  %v1677_v41 = vld [vmem:[%s1751_s19 + $0x6c] sm:$0xf]  ;;  %v1678_v10 = vld [vmem:[%s1751_s19 + $0x70] sm:$0xf] }
  0x7e   : > { %895 = vrot.lane.b32.xlu0 %v1502_v8, %s1705_s21  ;;  %v1285_v29 = vrot.slane %v1284_v14, 4  ;;  %v1500_v36 = vcombine.low %v1964_v40, %v1967_v39  ;;  %v1492_v52 = vcombine.low %v1975_v49, %v1989_v4  ;;  %v1501_v54 = vcombine.low %v2006_v46, %v2013_v57 }
  0x7f   : > { %v1280_v42 = vsel %vm1772_vm5, %v1275_v19, %v1279_v9  ;;  %v1300_v43 = vsel %vm1753_vm2, %v1298_v24, %v1299_v16  ;;  %v1493_v59 = vcombine.low %v2029_v11, %v2032_v12  ;;  %v1535_v61 = vcombine.low %v2052_v6, %v2059_v5 }
  0x80   : > { %v1290_v55 = vsel %vm1772_vm5, %v1285_v29, %v1289_v18  ;;  %v1544_v56 = vcombine.low %v1297_v20, %v1300_v43  ;;  %v1494_v63 = vcombine.low %v2075_v31, %v2078_v34  ;;  %v1486_v48 = vcombine.low %v2098_v30, %v2105_v23  ;;  %v1679_v18 = vld [vmem:[%s1751_s19 + $0x78] sm:$0xf] }
  0x81   : > { %v1543_v0 = vcombine.low %v1280_v42, %v1290_v55  ;;  %v1487_v3 = vcombine.low %v1675_v1, %v1676_v2  ;;  %v1495_v13 = vcombine.low %v1677_v41, %v1678_v10  ;;  %v1496_v19 = vcombine.low %v1679_v18, %v1782_v44 }
  0x82   : > { %1312 = vrot.lane.b32.xlu1 %v1544_v56, %s1704_s20  ;;  %v1488_v55 = vcombine.low %v1793_v51, %v1802_v62  ;;  %v1497_v2 = vcombine.low %v1816_v27, %v1826_v33  ;;  %v1489_v62 = vcombine.low %v1844_v53, %v1849_v58  ;;  %v1542_v41 = vcombine.low %v2128_v25, %v2138_v37  ;;  %v2233_v27 = vld [vmem:[%s2386_s1] sm:$0xf] }
  0x83   : > { %1307 = vrot.lane.b32.xlu0 %v1543_v0, %s1705_s21  ;;  %1584 = vmatprep.mubr.msk.bf16.mxu1 %vm1144_vm6, %v2233_v27  ;;  %v1706_v18 = vmov 0  }
  0x84   : > { %1656 = vset.pattern.permute.xlu0 %v1706_v18 }
  0x8c   : > { %v978_v32 = vpop.permute.xlu1 %977 }
  0x90   : > { %v994_v9 = vpop.permute.xlu1 %993 }
  0x91   : > { %v898_v7 = vpop.permute.xlu0 %897 }
  0x92   : > { %v1013_v8 = vsel %vm1007_vm7, %v1487_v3, %v898_v7 }
  0x93   : > { %v1060_v16 = vsel %vm1056_vm8, %v1013_v8, %v978_v32 }
  0x94   : > { %v2201_v29 = vsel %vm1144_vm6, %v1060_v16, 0 }
  0x98   : > { %v914_v15 = vpop.permute.xlu0 %913 }
  0x99   : > { %v1037_v14 = vsel %vm1007_vm7, %v1495_v13, %v914_v15  ;;  %v1498_v15 = vcombine.low %v1865_v22, %v1872_v28 }
  0x9a   : > { %v2196_v20 = vsel %vm1056_vm8, %v1037_v14, %v994_v9  ;;  %v1369_v14 = vld [vmem:[%s2387_s2] sm:$0xff] }
  0x9b   : > { %v916_v24 = vpop.permute.xlu1 %915  ;;  %1604 = vmatprep.subr.msk.bf16.mxu0 %vm1144_vm6, %v2196_v20  ;;  %1372 = vperm.xlu0 %1656, %v1369_v14  }
  0x9c   : > { %1551 = vmatpush3.bf16.xpose.msra.mxu0 %v2201_v29  ;;  %v1040_v42 = vsel %vm1007_vm7, %v1496_v19, %v916_v24  ;;  %v1490_v24 = vcombine.low %v1887_v45, %v1894_v50 }
  0x9f   : > { %v996_v43 = vpop.permute.xlu1 %995 }
  0xa0   : > { %v900_v56 = vpop.permute.xlu0 %899  ;;  %v2208_v44 = vsel %vm1056_vm8, %v1040_v42, %v996_v43 }
  0xa1   : > { %1605 = vmatprep.subr.msk.bf16.mxu0 %vm1144_vm6, %v2208_v44  ;;  %v1016_v0 = vsel %vm1007_vm7, %v1488_v55, %v900_v56 }
  0xa4   : > { %v980_v32 = vpop.permute.xlu0 %979 }
  0xa5   : > { %v1062_v1 = vsel %vm1056_vm8, %v1016_v0, %v980_v32 }
  0xa6   : > { %v2217_v3 = vsel %vm1144_vm6, %v1062_v1, 0 }
  0xa7   : > { %v918_v7 = vpop.permute.xlu1 %917  ;;  %1553 = vmatpush3.bf16.xpose.msra.mxu0 %v2217_v3 }
  0xa8   : > { %v1043_v51 = vsel %vm1007_vm7, %v1497_v2, %v918_v7 }
  0xab   : > { %v902_v8 = vpop.permute.xlu0 %901  ;;  %v998_v9 = vpop.permute.xlu1 %997 }
  0xac   : > { %v2226_v10 = vsel %vm1056_vm8, %v1043_v51, %v998_v9  ;;  %v1019_v33 = vsel %vm1007_vm7, %v1489_v62, %v902_v8 }
  0xad   : > { %1606 = vmatprep.subr.msk.bf16.mxu0 %vm1144_vm6, %v2226_v10 }
  0xaf   : > { %v982_v13 = vpop.permute.xlu0 %981 }
  0xb0   : > { %v1064_v53 = vsel %vm1056_vm8, %v1019_v33, %v982_v13 }
  0xb1   : > { %v2240_v58 = vsel %vm1144_vm6, %v1064_v53, 0 }
  0xb2   : > { %1555 = vmatpush3.bf16.xpose.msra.mxu0 %v2240_v58 }
  0xb5   : > { %v920_v16 = vpop.permute.xlu1 %919 }
  0xb6   : > { %v1046_v19 = vsel %vm1007_vm7, %v1498_v15, %v920_v16 }
  0xb7   : > { %v904_v42 = vpop.permute.xlu0 %903 }
  0xb8   : > { %v1022_v22 = vsel %vm1007_vm7, %v1490_v24, %v904_v42 }
  0xb9   : > { %v1000_v43 = vpop.permute.xlu1 %999 }
  0xba   : > { %v2252_v55 = vsel %vm1056_vm8, %v1046_v19, %v1000_v43 }
  0xbb   : > { %1607 = vmatprep.subr.msk.bf16.mxu0 %vm1144_vm6, %v2252_v55  ;;  %v984_v28 = vpop.permute.xlu0 %983 }
  0xbc   : > { %v1066_v56 = vsel %vm1056_vm8, %v1022_v22, %v984_v28 }
  0xbd   : > { %v2259_v0 = vsel %vm1144_vm6, %v1066_v56, 0 }
  0xbe   : > { %1557 = vmatpush3.bf16.xpose.msra.mxu0 %v2259_v0 }
  0xc0   : > { %v922_v45 = vpop.permute.xlu1 %921 }
  0xc1   : > { %v1049_v50 = vsel %vm1007_vm7, %v1499_v35, %v922_v45 }
  0xc4   : > { %v906_v32 = vpop.permute.xlu0 %905  ;;  %v1002_v1 = vpop.permute.xlu1 %1001 }
  0xc5   : > { %v2267_v2 = vsel %vm1056_vm8, %v1049_v50, %v1002_v1  ;;  %v1025_v7 = vsel %vm1007_vm7, %v1491_v17, %v906_v32 }
  0xc6   : > { %1608 = vmatprep.subr.msk.bf16.mxu0 %vm1144_vm6, %v2267_v2 }
  0xc8   : > { %v986_v51 = vpop.permute.xlu0 %985 }
  0xc9   : > { %v1068_v62 = vsel %vm1056_vm8, %v1025_v7, %v986_v51 }
  0xca   : > { %v2277_v21 = vsel %vm1144_vm6, %v1068_v62, 0 }
  0xcb   : > { %1559 = vmatpush3.bf16.xpose.msra.mxu0 %v2277_v21 }
  0xcc   : > { %v924_v38 = vpop.permute.xlu1 %923 }
  0xcd   : > { %v1052_v35 = vsel %vm1007_vm7, %v1500_v36, %v924_v38 }
  0xcf   : > { %v908_v8 = vpop.permute.xlu0 %907 }
  0xd0   : > { %v1004_v9 = vpop.permute.xlu1 %1003  ;;  %v1028_v60 = vsel %vm1007_vm7, %v1492_v52, %v908_v8 }
  0xd1   : > { %v1086_v47 = vsel %vm1056_vm8, %v1052_v35, %v1004_v9 }
  0xd2   : > { %1609 = vmatprep.subr.msk.bf16.mxu0 %vm1144_vm6, %v1086_v47 }
  0xd3   : > { %v988_v17 = vpop.permute.xlu0 %987 }
  0xd4   : > { %v1070_v33 = vsel %vm1056_vm8, %v1028_v60, %v988_v17 }
  0xd5   : > { %v1158_v13 = vsel %vm1144_vm6, %v1070_v33, 0 }
  0xd6   : > { %1561 = vmatpush3.bf16.xpose.msra.mxu0 %v1158_v13 }
  0xd8   : > { %v926_v40 = vpop.permute.xlu1 %925 }
  0xd9   : > { %v1055_v39 = vsel %vm1007_vm7, %v1501_v54, %v926_v40 }
  0xdb   : > { %v910_v36 = vpop.permute.xlu0 %909 }
  0xdc   : > { %v1006_v53 = vpop.permute.xlu1 %1005  ;;  %v1031_v49 = vsel %vm1007_vm7, %v1493_v59, %v910_v36 }
  0xdd   : > { %v1088_v15 = vsel %vm1056_vm8, %v1055_v39, %v1006_v53 }
  0xde   : > { %1610 = vmatprep.subr.msk.bf16.mxu0 %vm1144_vm6, %v1088_v15 }
  0xdf   : > { %v990_v4 = vpop.permute.xlu0 %989 }
  0xe0   : > { %v1072_v52 = vsel %vm1056_vm8, %v1031_v49, %v990_v4 }
  0xe1   : > { %v1160_v16 = vsel %vm1144_vm6, %v1072_v52, 0 }
  0xe2   : > { %1563 = vmatpush3.bf16.xpose.msra.mxu0 %v1160_v16 }
  0xe4   : > { %v1131_v46 = vpop.permute.xlu1 %1130 }
  0xe5   : > { %v1139_v57 = vsel %vm1007_vm7, %v1535_v61, %v1131_v46 }
  0xe7   : > { %v912_v54 = vpop.permute.xlu0 %911 }
  0xe8   : > { %v1136_v14 = vpop.permute.xlu1 %1135  ;;  %v1034_v11 = vsel %vm1007_vm7, %v1494_v63, %v912_v54  ;;  %v1545_v63 = vld [vmem:[%s2386_s1 + $0x8] sm:$0xf] }
  0xe9   : > { %v1141_v18 = vsel %vm1056_vm8, %v1139_v57, %v1136_v14 }
  0xea   : > { %1611 = vmatprep.subr.msk.bf16.mxu0 %vm1144_vm6, %v1141_v18 }
  0xeb   : > { %v992_v12 = vpop.permute.xlu0 %991 }
  0xec   : > { %v1074_v59 = vsel %vm1056_vm8, %v1034_v11, %v992_v12 }
  0xed   : > { %v1162_v19 = vsel %vm1144_vm6, %v1074_v59, 0  ;;  %1612 = vmatprep.subr.msk.bf16.mxu1 %vm1144_vm6, %v1074_v59 }
  0xee   : > { %1565 = vmatpush3.bf16.xpose.msra.mxu0 %v1162_v19  ;;  %v976_v6 = vpop.permute.xlu1 %975 }
  0xef   : > { %1620 = vmatprep.subr.msk.bf16.mxu0 %vm1144_vm6, %v2208_v44 }
  0xf0   : > { %v896_v5 = vpop.permute.xlu0 %895 }
  0xf1   : > { %v1010_v31 = vsel %vm1007_vm7, %v1486_v48, %v896_v5 }
  0xf2   : > { %v1058_v34 = vsel %vm1056_vm8, %v1010_v31, %v976_v6 }
  0xf3   : > { %v1224_v61 = vsel %vm1144_vm6, %v1058_v34, 0 }
  0xf4   : > { %1569 = vmatpush3.bf16.xpose.msra.mxu1 %v1224_v61 }
  0xf5   : > { %1613 = vmatprep.subr.msk.bf16.mxu1 %vm1144_vm6, %v2196_v20  ;;  %1567 = vmatmul.mubr.msk.bf16.vlgmr.msra.gmra.mrb[0].mxu0 %vm1144_vm6, %v2133_v26  ;;  %v1308_v30 = vpop.permute.xlu0 %1307  ;;  %v1313_v26 = vpop.permute.xlu1 %1312 }
  0xf6   : > { %1587 = vmatpush3.bf16.xpose.msra.mxu0 %v2217_v3  ;;  %1602 = vmatprep.mubr.msk.bf16.mxu0 %vm1144_vm6, %v1545_v63  ;;  %v1316_v23 = vsel %vm1007_vm7, %v1542_v41, %v1308_v30 }
  0xf7   : > { %1621 = vmatprep.subr.msk.bf16.mxu0 %vm1144_vm6, %v2226_v10  ;;  %v1318_v48 = vsel %vm1056_vm8, %v1316_v23, %v1313_v26 }
  0xfc   : > { %1571 = vmatpush3.bf16.xpose.msra.mxu1 %v2201_v29  ;;  %v1164_v29 = vsel %vm1144_vm6, %v2196_v20, 0 }
  0xfd   : > { %1614 = vmatprep.subr.msk.bf16.mxu1 %vm1144_vm6, %v2208_v44 }
  0xfe   : > { %1589 = vmatpush3.bf16.xpose.msra.mxu0 %v2240_v58 }
  0xff   : > { %1622 = vmatprep.subr.msk.bf16.mxu0 %vm1144_vm6, %v2252_v55 }
 0x104   : > { %1573 = vmatpush3.bf16.xpose.msra.mxu1 %v2217_v3 }
 0x105   : > { %1615 = vmatprep.subr.msk.bf16.mxu1 %vm1144_vm6, %v2226_v10 }
 0x106   : > { %1591 = vmatpush3.bf16.xpose.msra.mxu0 %v2259_v0 }
 0x107   : > { %1623 = vmatprep.subr.msk.bf16.mxu0 %vm1144_vm6, %v2267_v2 }
 0x10c   : > { %1575 = vmatpush3.bf16.xpose.msra.mxu1 %v2240_v58 }
 0x10d   : > { %1616 = vmatprep.subr.msk.bf16.mxu1 %vm1144_vm6, %v2252_v55 }
 0x10e   : > { %1593 = vmatpush3.bf16.xpose.msra.mxu0 %v2277_v21 }
 0x10f   : > { %1624 = vmatprep.subr.msk.bf16.mxu0 %vm1144_vm6, %v1086_v47 }
 0x114   : > { %1577 = vmatpush3.bf16.xpose.msra.mxu1 %v2259_v0 }
 0x115   : > { %1617 = vmatprep.subr.msk.bf16.mxu1 %vm1144_vm6, %v2267_v2 }
 0x116   : > { %1595 = vmatpush3.bf16.xpose.msra.mxu0 %v1158_v13 }
 0x117   : > { %1625 = vmatprep.subr.msk.bf16.mxu0 %vm1144_vm6, %v1088_v15 }
 0x11a   : > { %v1373_v24 = vpop.permute.xlu0 %1372 }
 0x11c   : > { %1579 = vmatpush3.bf16.xpose.msra.mxu1 %v2277_v21 }
 0x11d   : > { %1618 = vmatprep.subr.msk.bf16.mxu1 %vm1144_vm6, %v1086_v47 }
 0x11e   : > { %1597 = vmatpush3.bf16.xpose.msra.mxu0 %v1160_v16 }
 0x11f   : > { %1626 = vmatprep.subr.msk.bf16.mxu0 %vm1144_vm6, %v1141_v18 }
 0x124   : > { %1581 = vmatpush3.bf16.xpose.msra.mxu1 %v1158_v13 }
 0x125   : > { %1619 = vmatprep.subr.msk.bf16.mxu1 %vm1144_vm6, %v1088_v15 }
 0x126   : > { %1599 = vmatpush3.bf16.xpose.msra.mxu0 %v1162_v19 }
 0x127   : > { %1627 = vmatprep.subr.msk.bf16.mxu0 %vm1144_vm6, %v1318_v48 }
 0x12c   : > { %1583 = vmatpush3.bf16.xpose.msra.mxu1 %v1160_v16 }
 0x12e   : > { %1601 = vmatpush3.bf16.xpose.msra.mxu0 %v1164_v29 }
 0x133   : > { %1585 = vmatmul.mubr.msk.bf16.vlgmr.msra.gmra.mrb[0].mxu1 %vm1144_vm6, %v2233_v27 }
 0x135   : > { %1603 = vmatmul.mubr.msk.bf16.vlgmr.msra.gmra.mrb[4].mxu0 %vm1144_vm6, %v1545_v63 }
 0x1c8   : > { %v1214_v25 = vpop.f32.mrb[0].mxu0 }
 0x1c9   : > { %v1216_v37 = vpop.f32.mrb[1].mxu0 }
 0x1ca   : > { %v1218_v44 = vpop.f32.mrb[2].mxu0 }
 0x1cb   : > { %v1219_v3 = vpop.f32.mrb[3].mxu0 }
 0x206   : > { %v1260_v41 = vpop.f32.mrb[0].mxu1 }
 0x207   : > { %v1261_v10 = vadd.f32 %v1260_v41, %v1214_v25  ;;  %v1262_v58 = vpop.f32.mrb[1].mxu1 }
 0x208   : > { %v1263_v42 = vadd.f32 %v1262_v58, %v1216_v37  ;;  %v1264_v43 = vpop.f32.mrb[2].mxu1  ;;  %v1360_v55 = vpop.f32.mrb[4].mxu0 }
 0x209   : > { %v1265_v22 = vpop.f32.mrb[3].mxu1  ;;  %v1367_v20 = vadd.f32 %v1360_v55, %v1261_v10  ;;  %v1362_v28 = vpop.f32.mrb[5].mxu0 }
 0x20a   : > { %v1368_v56 = vadd.f32 %v1362_v28, %v1263_v42  ;;  %v1364_v27 = vpop.f32.mrb[6].mxu0 }
 0x20b   : > { %v1375_v0 = vadd.f32 %v1373_v24, %v1367_v20  ;;  %v1365_v45 = vpop.f32.mrb[7].mxu0 }
 0x20c   : > { %v1376_v50 = vadd.f32 %v1373_v24, %v1368_v56 }
 0x20d   : > { %v1377_v32 = vmax.f32 %v1375_v0, 0.0 }
 0x20e   : > { %v1378_v1 = vmax.f32 %v1376_v50, 0.0 }
 0x20f   : > { %1379 = vst [vmem:[%s192_s6] sm:$0xff] %v1377_v32 }
 0x210   : > { %1380 = vst [vmem:[%s192_s6 + $0x8] sm:$0xff] %v1378_v1 }
 0x211 PF: > { %s13_s14 = sadd.s32 1, %s1702_s14   ;;  %s2393_s12 = smov %s1698_s13 }
 0x212   : > { %p10_p5 = scmp.ge.s32.totalorder %s13_s14, 4   ;;  %s2394_s13 = smov %s2396_s15 }
 0x214   :  { %12 = sbr.rel (!%p10_p5) target bundleno = 2 (0x2), region = 64 }

</bundles_post_ra>
